<compile_context>
chip_gen: v7x
topology: tpu7x:2x2x1
jax: 0.10.0
libtpu: 0.0.40
codegen_flags: <defaults>
</compile_context>

<pallas_src>
import jax
import jax.numpy as jnp
from jax.experimental import pallas as pl
from jax.experimental.pallas import tpu as pltpu

WIDTH = 512            # slab lane width (multiple of 128) -> unmasked full-width vst
MAX_TILE_ROWS = 1024   # 1024 x 512 x 4B = 2 MiB per tile (v5e-safe with double buffering)
MIN_GRID_STEPS = 8     # aim for >= 8 grid steps so v7x's 2 TCs + DMA pipeline stay busy
ROW_ALIGN = 8          # sublane alignment for block row dims
_TINY_N = 1 << 20      # below ~1M elements, fused XLA elementwise beats pallas_call overhead


def mock_module_kernel(scal_ref, x_ref, o_ref):
    # scal_ref: (2,) f32 in SMEM = [w, b + buffer]   (scalar path, no VMEM DMA)
    # x_ref / o_ref: (tile_rows, 512) f32 VMEM tiles (lane-dense, full-width stores)
    w = scal_ref[0]
    c = scal_ref[1]
    o_ref[...] = x_ref[...] * w + c


def mock_module_forward(x, weight, bias, buffer, *, force_pallas=False):
    """x: (..., 1) f32; weight: (1, 1); bias: (1,); buffer: (1,) -> same shape as x."""
    orig_shape = x.shape
    n = int(x.size)  # in_features == 1, so every element maps independently

    w = weight.reshape(()).astype(jnp.float32)
    c = (bias.reshape(()) + buffer.reshape(())).astype(jnp.float32)  # fold b + buffer

    if n == 0:
        return jnp.zeros(orig_shape, jnp.float32)

    if (not force_pallas) and n < _TINY_N:
        # Small batch: fixed pallas_call overhead dominates; let XLA fuse it.
        return x.astype(jnp.float32) * w + c

    # ---- lane-dense slab: flatten (free), minimal pad, view as (rows, 512) --
    flat = jnp.ravel(x).astype(jnp.float32)
    chunk = ROW_ALIGN * WIDTH                 # 4096 elements
    pad_n = (-n) % chunk                      # <= 4095 extra elements
    if pad_n:
        # TODO(synk): for ragged n this pad (and the matching output slice)
        # each re-stream the array once through HBM; a manual-DMA tail inside
        # the kernel would remove them entirely.
        flat = jnp.pad(flat, (0, pad_n))
    rows = (n + pad_n) // WIDTH               # always a multiple of 8
    slab = flat.reshape(rows, WIDTH)

    # Tile sizing: as large as the VMEM budget allows, but keep >= MIN_GRID_STEPS
    # grid steps when there is enough data, and never exceed the array.
    rows_per_step = pl.cdiv(rows, MIN_GRID_STEPS)
    tile_rows = ((rows_per_step + ROW_ALIGN - 1) // ROW_ALIGN) * ROW_ALIGN
    tile_rows = max(ROW_ALIGN, min(MAX_TILE_ROWS, tile_rows, rows))
    grid_len = pl.cdiv(rows, tile_rows)       # ragged final block handled by Pallas

    scal = jnp.stack([w, c])  # (2,) f32 -> SMEM, resident across all grid steps

    out_slab = pl.pallas_call(
        mock_module_kernel,
        out_shape=jax.ShapeDtypeStruct((rows, WIDTH), jnp.float32),
        grid_spec=pltpu.PrefetchScalarGridSpec(
            num_scalar_prefetch=0,
            grid=(grid_len,),
            in_specs=[
                pl.BlockSpec(memory_space=pltpu.MemorySpace.SMEM),   # [w, b+buf]
                pl.BlockSpec((tile_rows, WIDTH), lambda i: (i, 0)),  # x tile
            ],
            out_specs=pl.BlockSpec((tile_rows, WIDTH), lambda i: (i, 0)),
        ),
        compiler_params=pltpu.CompilerParams(
            dimension_semantics=("parallel",),
        ),
    )(scal, slab)

    out_flat = out_slab.reshape(-1)
    if pad_n:
        out_flat = out_flat[:n]               # only materializes for ragged n
    return out_flat.reshape(orig_shape)


if __name__ == "__main__":
    key = jax.random.PRNGKey(0)

    # Deterministic parameters (shapes from MockModule.__init__):
    #   l1 = nn.Linear(1, 1) -> weight (1, 1), bias (1,);  buffer = torch.ones(1)
    weight = jnp.array([[0.5]], dtype=jnp.float32)
    bias = jnp.array([-0.25], dtype=jnp.float32)
    buffer = jnp.ones((1,), dtype=jnp.float32)

    # Small input consistent with the forward: (batch, in_features=1)
    x = jax.random.normal(key, (8, 1), dtype=jnp.float32)
    out = jax.block_until_ready(
        mock_module_forward(x, weight, bias, buffer, force_pallas=True)
    )
    ref = x @ weight.T + bias + buffer
    assert out.shape == (8, 1)
    assert jnp.allclose(out, ref, atol=1e-6), "mismatch vs reference (small)"

    # Second check: exercises the ragged-tail pad/slice path and a 2-step grid.
    key2 = jax.random.PRNGKey(1)
    x_big = jax.random.normal(key2, (4099, 1), dtype=jnp.float32)
    out_big = jax.block_until_ready(
        mock_module_forward(x_big, weight, bias, buffer, force_pallas=True)
    )
    ref_big = x_big @ weight.T + bias + buffer
    assert out_big.shape == x_big.shape
    assert jnp.allclose(out_big, ref_big, atol=1e-6), "mismatch vs reference (tiled)"

    print("KERNEL_OK")
</pallas_src>

<mosaic_0001>
module attributes {stable_mosaic.version = 11 : i64} {
  func.func @mock_module_kernel(%arg0: i32, %arg1: memref<2xf32, #tpu.memory_space<smem>>, %arg2: memref<8x512xf32, #tpu.memory_space<vmem>>, %arg3: memref<8x512xf32, #tpu.memory_space<vmem>>) attributes {dimension_semantics = [#tpu.dimension_semantics<parallel>], iteration_bounds = array<i64: 1>, scalar_prefetch = 0 : i64, scratch_operands = 0 : i64, tpu.core_type = #tpu.core_type<tc>, window_params = [{transform_indices = @transform_0, window_bounds = array<i64: 2>}, {transform_indices = @transform_1, window_bounds = array<i64: 8, 512>}, {transform_indices = @transform_2, window_bounds = array<i64: 8, 512>}]} {
    %c0 = arith.constant 0 : index
    %0 = memref.load %arg1[%c0] : memref<2xf32, #tpu.memory_space<smem>>
    %c1 = arith.constant 1 : index
    %1 = memref.load %arg1[%c1] : memref<2xf32, #tpu.memory_space<smem>>
    %c0_0 = arith.constant 0 : index
    %c0_1 = arith.constant 0 : index
    %2 = vector.load %arg2[%c0_0, %c0_1] : memref<8x512xf32, #tpu.memory_space<vmem>>, vector<8x512xf32>
    %3 = vector.broadcast %0 : f32 to vector<8x512xf32>
    %4 = arith.mulf %2, %3 : vector<8x512xf32>
    %5 = vector.broadcast %1 : f32 to vector<8x512xf32>
    %6 = arith.addf %4, %5 : vector<8x512xf32>
    %c0_2 = arith.constant 0 : index
    %c0_3 = arith.constant 0 : index
    %7 = vector.load %arg3[%c0_2, %c0_3] : memref<8x512xf32, #tpu.memory_space<vmem>>, vector<8x512xf32>
    tpu.vector_store %arg3[%c0_2, %c0_3], %6 {strides = array<i32>} : memref<8x512xf32, #tpu.memory_space<vmem>>, vector<8x512xf32>,
    return
  }
  func.func @transform_0(%arg0: i32) -> i32 {
    %c0_i32 = arith.constant 0 : i32
    %c0_i32_0 = arith.constant 0 : i32
    return %c0_i32 : i32
  }
  func.func @transform_1(%arg0: i32) -> (i32, i32) {
    %c0_i32 = arith.constant 0 : i32
    %c0_i32_0 = arith.constant 0 : i32
    return %arg0, %c0_i32 : i32, i32
  }
  func.func @transform_2(%arg0: i32) -> (i32, i32) {
    %c0_i32 = arith.constant 0 : i32
    %c0_i32_0 = arith.constant 0 : i32
    return %arg0, %c0_i32 : i32, i32
  }
}

</mosaic_0001>

<bundles_post_ra>
// kernel: tpu_custom_call.1
= control target key start
LH: loop header
LB: loop body
LE: loop exit
PB: predicated region body
PF: predicated region fallthrough
CT: control target
= control target key end

     0   :  { %7 = vsyncpa [#allocation5], 0  ;;  %s189_s0 = inlined_call_operand.hbm [shape: f32[2], index: 0, kind: input, shape index: {}]   ;;  %s190_s1 = inlined_call_operand.hbm [shape: f32[8,512], index: 1, kind: input, shape index: {}]   ;;  %s191_s2 = inlined_call_operand.hbm [shape: f32[8,512], index: 2, kind: output, shape index: {}]  }
   0x1   :  { %8 = vsyncpa [#allocation3], 0 }
   0x2   :  { %9 = vsyncpa [#allocation4], 0  ;;  %s75_s11 = scalar_lea.hbm %s189_s0, 16 }
   0x3   :  { %p76_p0 = scmp.ne.s32.totalorder %s189_s0, %s75_s11  ;;  %p79_p1 = scmp.lt.u32.totalorder %s75_s11, %s189_s0 }
   0x5   :  { %p81_p2 = pnand %p79_p1, %p76_p0 }
   0x7   :  { %84 = shalt.err (!%p81_p2)
}
   0x8   :  { %s135_s16 = smov [#allocation2]   ;;  %s136_s19 = smov [#allocation6]  }
   0x9   :  { %17 = dma.hbm_to_smem %s189_s0, 16, %s135_s16, [#allocation5]  }
   0xa   :  { %s24_s20 = sshll.u32 %s136_s19, 4  ;;  %s85_s23 = scalar_lea.hbm %s190_s1, 512  ;;  %s25_s20 = int_to_ptr.vmem [resolvable:$true] %s24_s20 }
   0xb   :  { %p86_p3 = scmp.ne.s32.totalorder %s190_s1, %s85_s23  ;;  %p89_p4 = scmp.lt.u32.totalorder %s85_s23, %s190_s1 }
   0xd   :  { %p91_p5 = pnand %p89_p4, %p86_p3 }
   0xf   :  { %94 = shalt.err (!%p91_p5)
}
  0x10   :  { %s95_s28 = scalar_lea.vmem %s25_s20, 512  ;;  %p100_p7 = scmp.lt.s32.totalorder %s25_s20, %s25_s20 }
  0x11   :  { %p96_p6 = scmp.ne.s32.totalorder %s25_s20, %s95_s28  ;;  %p101_p8 = scmp.lt.s32.totalorder %s95_s28, %s95_s28 }
  0x13   :  { %p102_p9 = por %p101_p8, %p100_p7 }
  0x15   :  { %p103_p10 = pnand %p102_p9, %p96_p6 }
  0x17   :  { %106 = shalt.err (!%p103_p10)
}
  0x18   :  { %27 = dma.hbm_to_vmem [thread:$0]  %s190_s1, 512, %s25_s20, [#allocation3]  }
  0x19   :  { %129 = dma.done.wait [#allocation5], 16  }
  0x1a   :  { %130 = vsyncadd [#allocation5], 4294967280 }
  0x1b   :  { %131 = dma.done.wait [#allocation3], 512  }
  0x1c   :  { %132 = vsyncadd [#allocation3], 4294966784 }
  0x1d   :  { %34 = sfence }
  0x1e   :  { %s35_s30 = sld [smem:[#allocation2]]  ;;  %s71_s3 = sld [smem:[#allocation2 + $0x1]]  ;;  %v37_v0 = vld [vmem:[#allocation6] sm:$0xff]  ;;  %v38_v1 = vld [vmem:[#allocation6 + $0x8] sm:$0xff]  ;;  %v39_v2 = vld [vmem:[#allocation6 + $0x10] sm:$0xff] }
  0x1f   :  { %v40_v3 = vld [vmem:[#allocation6 + $0x18] sm:$0xff]  ;;  %s137_s4 = smov [#allocation7]  }
  0x20   :  { %s61_s5 = sshll.u32 %s137_s4, 4  ;;  %s62_s5 = int_to_ptr.vmem [resolvable:$true] %s61_s5 }
  0x21   :  { %s107_s1 = scalar_lea.vmem %s62_s5, 512  ;;  %p112_p12 = scmp.lt.s32.totalorder %s62_s5, %s62_s5 }
  0x22   :  { %p108_p11 = scmp.ne.s32.totalorder %s62_s5, %s107_s1  ;;  %p113_p13 = scmp.lt.s32.totalorder %s107_s1, %s107_s1 }
  0x24   :  { %v41_v4 = vstv %s35_s30  ;;  %v46_v5 = vstv %s71_s3  ;;  %p114_p0 = por %p113_p13, %p112_p12 }
  0x25   :  { %v42_v6 = vmul.f32 %v41_v4, %v37_v0  ;;  %v43_v7 = vmul.f32 %v41_v4, %v38_v1  ;;  %v44_v8 = vmul.f32 %v41_v4, %v39_v2  ;;  %v45_v9 = vmul.f32 %v41_v4, %v40_v3 }
  0x26   :  { %p115_p1 = pnand %p114_p0, %p108_p11 }
  0x27   :  { %v47_v10 = vadd.f32 %v46_v5, %v42_v6  ;;  %v48_v11 = vadd.f32 %v46_v5, %v43_v7  ;;  %v49_v12 = vadd.f32 %v46_v5, %v44_v8  ;;  %v50_v13 = vadd.f32 %v46_v5, %v45_v9 }
  0x29   :  { %51 = vst [vmem:[#allocation7] sm:$0xff] %v47_v10  ;;  %52 = vst [vmem:[#allocation7 + $0x8] sm:$0xff] %v48_v11 }
  0x2a   :  { %53 = vst [vmem:[#allocation7 + $0x10] sm:$0xff] %v49_v12  ;;  %54 = vst [vmem:[#allocation7 + $0x18] sm:$0xff] %v50_v13 }
  0x2b   :  { %118 = shalt.err (!%p115_p1)
}
  0x2c   :  { %s119_s8 = scalar_lea.hbm %s191_s2, 512 }
  0x2d   :  { %p120_p2 = scmp.ne.s32.totalorder %s191_s2, %s119_s8  ;;  %p123_p3 = scmp.lt.u32.totalorder %s119_s8, %s191_s2 }
  0x2f   :  { %p125_p4 = pnand %p123_p3, %p120_p2 }
  0x31   :  { %128 = shalt.err (!%p125_p4)
}
  0x32   :  { %64 = dma.vmem_to_hbm [thread:$0]  %s62_s5, 512, %s191_s2, [#allocation4]  }
  0x33   :  { %133 = dma.done.wait [#allocation4], 512  }
  0x34   :  { %134 = vsyncadd [#allocation4], 4294966784 }
  0x35   :  { %68 = vsyncpa [#allocation3], 1 }
  0x36   :  { %69 = vsyncpa [#allocation4], 1 }
  0x37   :  { %70 = vsyncpa [#allocation5], 1 }

</bundles_post_ra>
